<compile_context>
chip_gen: v7x
topology: tpu7x:2x2x1
jax: 0.10.0
libtpu: 0.0.40
codegen_flags: <defaults>
</compile_context>

<pallas_src>
import math
from functools import partial

import jax
import jax.numpy as jnp
from jax import lax
from jax.experimental import pallas as pl
from jax.experimental.pallas import tpu as pltpu

_INV_SQRT2 = 1.0 / math.sqrt(2.0)
_LANE = 128
_SUBLANE = 8


def _round_up(a, b):
    return (a + b - 1) // b * b


def _device_kind():
    try:
        return jax.devices()[0].device_kind.lower()
    except Exception:
        return ""


def _vmem_budget_bytes(kind):
    # v7x: 64 MiB physical VMEM per TC -> leave headroom for compiler-internal scratch.
    if "v7" in kind:
        return 52 << 20
    # v5e / v6e: 128 MiB physical (32 MiB scoped default) -> allow ~100 MiB.
    return 100 << 20


def _num_tensorcores(kind):
    # v7x has 2 TensorCores per chip (megacore); v5e/v6e have 1.
    return 2 if "v7" in kind else 1


def _gelu(h, approx):
    if approx:
        # tanh approximation: runs on the EUP (otherwise-idle slot).  Opt-in (numerics differ
        # slightly from nn.GELU() exact erf).
        c = math.sqrt(2.0 / math.pi)
        return 0.5 * h * (1.0 + jnp.tanh(c * (h + 0.044715 * h * h * h)))
    return 0.5 * h * (1.0 + lax.erf(h * _INV_SQRT2))


# ---------------------------------------------------------------------------
# Kernels
# ---------------------------------------------------------------------------

def _mtp_head_kernel(x_ref, w1_ref, b1_ref, w2_ref, b2_ref, g_ref, o_ref, *,
                     eps, inv_h, compute_dtype, approx_gelu):
    # x_ref: [tm, Hp]; w1: [Hp, H4p]; b1: [1, H4p]; w2: [H4p, Hp]; b2/gamma: [1, Hp].
    x = x_ref[...]
    x_mm = x if x.dtype == compute_dtype else x.astype(compute_dtype)

    h = jnp.dot(x_mm, w1_ref[...], preferred_element_type=jnp.float32) + b1_ref[...]
    h = _gelu(h, approx_gelu)
    p = jnp.dot(h.astype(compute_dtype), w2_ref[...],
                preferred_element_type=jnp.float32) + b2_ref[...]

    # Residual + Mistral RMSNorm in f32.  Padded lanes of y are exactly zero (zero-padded x,
    # W2 columns, b2), so summing over the padded lane axis and dividing by the REAL H is exact.
    y = x.astype(jnp.float32) + p
    var = jnp.sum(y * y, axis=-1, keepdims=True) * inv_h
    o_ref[...] = (g_ref[...] * (y * lax.rsqrt(var + eps))).astype(o_ref.dtype)


def _mtp_head_kernel_ktiled(x_ref, w1_ref, b1_ref, w2_ref, b2_ref, g_ref, o_ref,
                            acc_ref, *, eps, inv_h, compute_dtype, approx_gelu):
    # Streamed-weight path: grid = (M tiles, H4 tiles); acc_ref accumulates the projection.
    k = pl.program_id(1)

    @pl.when(k == 0)
    def _():
        acc_ref[...] = jnp.zeros_like(acc_ref)

    x = x_ref[...]
    x_mm = x if x.dtype == compute_dtype else x.astype(compute_dtype)

    # Padded H4 lanes: w1 column pad and b1 pad are zero -> h = gelu(0) = 0 there, and the
    # corresponding (zero) rows of w2 contribute nothing -> exact.
    h = jnp.dot(x_mm, w1_ref[...], preferred_element_type=jnp.float32) + b1_ref[...]
    h = _gelu(h, approx_gelu)
    acc_ref[...] += jnp.dot(h.astype(compute_dtype), w2_ref[...],
                            preferred_element_type=jnp.float32)

    @pl.when(k == pl.num_programs(1) - 1)
    def _():
        y = x.astype(jnp.float32) + acc_ref[...] + b2_ref[...]
        var = jnp.sum(y * y, axis=-1, keepdims=True) * inv_h
        o_ref[...] = (g_ref[...] * (y * lax.rsqrt(var + eps))).astype(o_ref.dtype)


# ---------------------------------------------------------------------------
# Wrapper
# ---------------------------------------------------------------------------

def prepare_mtp_head_params(w1, b1, w2, b2, gamma, *, compute_dtype=jnp.bfloat16):
    """One-time (model-init) weight preparation: lane-align pad + cast to the MXU compute dtype.

    w1: [H, H//4], w2: [H//4, H] stored [in, out].  All pads are zeros -> exact results.
    """
    compute_dtype = jnp.dtype(compute_dtype)
    H, H4 = w1.shape
    Hp = _round_up(H, _LANE)
    H4p = _round_up(H4, _LANE)
    f32 = jnp.float32
    return dict(
        H=H, H4=H4, Hp=Hp, H4p=H4p, compute_dtype=compute_dtype,
        w1=jnp.pad(w1, ((0, Hp - H), (0, H4p - H4))).astype(compute_dtype),
        w2=jnp.pad(w2, ((0, H4p - H4), (0, Hp - H))).astype(compute_dtype),
        b1=jnp.pad(b1.reshape(1, H4).astype(f32), ((0, 0), (0, H4p - H4))),
        b2=jnp.pad(b2.reshape(1, H).astype(f32), ((0, 0), (0, Hp - H))),
        gamma=jnp.pad(gamma.reshape(1, H).astype(f32), ((0, 0), (0, Hp - H))),
    )


def lightweight_mtp_head(prev_attention_output, params, *, eps=1e-6, tm=None,
                         tk=None, force_weight_tiling=False, approx_gelu=False):
    """prev_attention_output: [B, S, H].  params: from prepare_mtp_head_params().  Returns [B, S, H]."""
    B, S, H = prev_attention_output.shape
    assert H == params["H"], "hidden size mismatch with prepared params"
    H4, Hp, H4p = params["H4"], params["Hp"], params["H4p"]
    compute_dtype = params["compute_dtype"]
    M = B * S
    in_dtype = prev_attention_output.dtype
    in_sz = jnp.dtype(in_dtype).itemsize
    out_sz = in_sz
    w_sz = compute_dtype.itemsize

    kind = _device_kind()
    budget = _vmem_budget_bytes(kind)
    num_cores = _num_tensorcores(kind)
    headroom = 4 << 20

    # Resident (single-buffered) weight footprint and per-row VMEM cost including body temporaries.
    small_bytes = (H4p + 2 * Hp) * 4
    w_resident = 2 * Hp * H4p * w_sz + small_bytes
    per_row = (2 * Hp * in_sz + 2 * Hp * out_sz          # double-buffered x / out pipeline tiles
               + 4 * Hp * 4 + 2 * H4p * 4                # f32 body temporaries (xf, p, y, out / h, gelu)
               + Hp * w_sz + H4p * w_sz)                 # compute-dtype casts fed to the MXU

    use_ktile = force_weight_tiling or (tk is not None) or \
        (w_resident + _SUBLANE * per_row + headroom > budget)

    # Only the lane (H) axis needs padding; rows are independent so partial M tiles are fine
    # (garbage rows in the last tile produce garbage -- possibly inf/NaN -- that is never stored).
    x2d = prev_attention_output.reshape(M, H)
    if Hp != H:
        x2d = jnp.pad(x2d, ((0, 0), (0, Hp - H)))

    cost = pl.CostEstimate(
        flops=4 * M * H * H4,                     # two matmuls: 2*M*H*H4 each
        transcendentals=M * H4 + M,               # erf per bottleneck element + rsqrt per row
        bytes_accessed=(M * H * (in_sz + out_sz)
                        + 2 * H * H4 * w_sz + (H4 + 2 * H) * 4),
    )

    inv = pl.Buffered(1)  # grid-invariant operands: single buffer, fetched once
    rows_per_core = -(-M // num_cores)

    if not use_ktile:
        if tm is None:
            avail = budget - w_resident - headroom
            tm_vmem = max(_SUBLANE, (avail // per_row) // _SUBLANE * _SUBLANE)
            tm = min(512, tm_vmem, _round_up(rows_per_core, _SUBLANE))
        tm = max(_SUBLANE, _round_up(int(tm), _SUBLANE))
        grid_m = pl.cdiv(M, tm)
        vmem_limit = int(min(budget, max(w_resident + tm * per_row + headroom, 16 << 20)))

        out2d = pl.pallas_call(
            partial(_mtp_head_kernel, eps=float(eps), inv_h=1.0 / H,
                    compute_dtype=compute_dtype, approx_gelu=approx_gelu),
            out_shape=jax.ShapeDtypeStruct((M, Hp), in_dtype),
            grid_spec=pltpu.PrefetchScalarGridSpec(
                num_scalar_prefetch=0,
                grid=(grid_m,),
                in_specs=[
                    pl.BlockSpec((tm, Hp), lambda i: (i, 0)),                          # x rows
                    pl.BlockSpec((Hp, H4p), lambda i: (0, 0), pipeline_mode=inv),      # W1
                    pl.BlockSpec((1, H4p), lambda i: (0, 0), pipeline_mode=inv),       # b1
                    pl.BlockSpec((H4p, Hp), lambda i: (0, 0), pipeline_mode=inv),      # W2
                    pl.BlockSpec((1, Hp), lambda i: (0, 0), pipeline_mode=inv),        # b2
                    pl.BlockSpec((1, Hp), lambda i: (0, 0), pipeline_mode=inv),        # gamma
                ],
                out_specs=pl.BlockSpec((tm, Hp), lambda i: (i, 0)),
            ),
            compiler_params=pltpu.CompilerParams(
                dimension_semantics=("parallel",),
                vmem_limit_bytes=vmem_limit,
            ),
            cost_estimate=cost,
        )(x2d, params["w1"], params["b1"], params["w2"], params["b2"], params["gamma"])
    else:
        # Streamed-weight fallback: tile the bottleneck (H4) dimension; W1/W2 column/row blocks
        # are pipelined while a resident f32 accumulator holds the projection.
        if tk is None:
            tk = min(512, H4p)
        tk = min(H4p, max(_LANE, _round_up(int(tk), _LANE)))
        while tk > _LANE and 4 * Hp * tk * w_sz > budget // 2:
            tk = max(_LANE, (tk // 2) // _LANE * _LANE)
        while H4p % tk != 0:      # ragged weight blocks would read undefined pad -> must divide
            tk -= _LANE
        grid_k = H4p // tk

        per_row_kt = (2 * Hp * in_sz + 2 * Hp * out_sz    # pipelined x / out tiles
                      + Hp * 4                            # f32 accumulator scratch
                      + 3 * Hp * 4 + 2 * tk * 4           # f32 body temporaries
                      + Hp * w_sz + tk * w_sz)            # compute-dtype casts
        w_stream = 2 * (2 * Hp * tk * w_sz + tk * 4) + 2 * Hp * 4

        if tm is None:
            avail = max(budget - w_stream - headroom, _SUBLANE * per_row_kt)
            tm_vmem = max(_SUBLANE, (avail // per_row_kt) // _SUBLANE * _SUBLANE)
            tm = min(512, tm_vmem, _round_up(rows_per_core, _SUBLANE))
        tm = max(_SUBLANE, _round_up(int(tm), _SUBLANE))
        grid_m = pl.cdiv(M, tm)
        vmem_limit = int(min(budget, max(w_stream + tm * per_row_kt + headroom, 16 << 20)))

        out2d = pl.pallas_call(
            partial(_mtp_head_kernel_ktiled, eps=float(eps), inv_h=1.0 / H,
                    compute_dtype=compute_dtype, approx_gelu=approx_gelu),
            out_shape=jax.ShapeDtypeStruct((M, Hp), in_dtype),
            grid_spec=pltpu.PrefetchScalarGridSpec(
                num_scalar_prefetch=0,
                grid=(grid_m, grid_k),
                in_specs=[
                    pl.BlockSpec((tm, Hp), lambda i, k: (i, 0)),                       # x rows
                    pl.BlockSpec((Hp, tk), lambda i, k: (0, k)),                       # W1 column block
                    pl.BlockSpec((1, tk), lambda i, k: (0, k)),                        # b1 block
                    pl.BlockSpec((tk, Hp), lambda i, k: (k, 0)),                       # W2 row block
                    pl.BlockSpec((1, Hp), lambda i, k: (0, 0), pipeline_mode=inv),     # b2
                    pl.BlockSpec((1, Hp), lambda i, k: (0, 0), pipeline_mode=inv),     # gamma
                ],
                out_specs=pl.BlockSpec((tm, Hp), lambda i, k: (i, 0)),
                scratch_shapes=[pltpu.VMEM((tm, Hp), jnp.float32)],
            ),
            compiler_params=pltpu.CompilerParams(
                dimension_semantics=("parallel", "arbitrary"),
                vmem_limit_bytes=vmem_limit,
            ),
            cost_estimate=cost,
        )(x2d, params["w1"], params["b1"], params["w2"], params["b2"], params["gamma"])

    if Hp != H:
        out2d = out2d[:, :H]
    return out2d.reshape(B, S, H)


# ---------------------------------------------------------------------------
# Reference + self-test
# ---------------------------------------------------------------------------

def _reference(prev_attention_output, w1, b1, w2, b2, gamma, eps=1e-6):
    x = prev_attention_output.astype(jnp.float32)
    h = x @ w1 + b1
    h = 0.5 * h * (1.0 + lax.erf(h / jnp.sqrt(2.0)))
    p = h @ w2 + b2
    y = x + p
    var = jnp.mean(y * y, axis=-1, keepdims=True)
    return gamma * (y * lax.rsqrt(var + eps))


if __name__ == "__main__":
    # Small config consistent with the module: hidden_size=32 -> bottleneck 8.
    B, S, H = 2, 8, 32
    H4 = H // 4
    eps = 1e-6

    key = jax.random.PRNGKey(0)
    k_base, k_prev, k_w1, k_b1, k_w2, k_b2 = jax.random.split(key, 6)

    # base_hidden_state is a forward() input but unused when attention weights are shared.
    base_hidden_state = jax.random.normal(k_base, (B, S, H), dtype=jnp.float32)
    prev_attention_output = jax.random.normal(k_prev, (B, S, H), dtype=jnp.float32)

    bound1 = 1.0 / math.sqrt(H)
    bound2 = 1.0 / math.sqrt(H4)
    w1 = jax.random.uniform(k_w1, (H, H4), jnp.float32, -bound1, bound1)
    b1 = jax.random.uniform(k_b1, (H4,), jnp.float32, -bound1, bound1)
    w2 = jax.random.uniform(k_w2, (H4, H), jnp.float32, -bound2, bound2)
    b2 = jax.random.uniform(k_b2, (H,), jnp.float32, -bound2, bound2)
    gamma = jnp.ones((H,), jnp.float32)  # MistralRMSNorm weight initialized to ones

    ref = _reference(prev_attention_output, w1, b1, w2, b2, gamma, eps=eps)

    # 1) f32 MXU path: faithful to the PyTorch module -> tight tolerance.
    params_f32 = prepare_mtp_head_params(w1, b1, w2, b2, gamma, compute_dtype=jnp.float32)
    out_f32 = jax.block_until_ready(lightweight_mtp_head(prev_attention_output, params_f32, eps=eps))
    assert out_f32.shape == (B, S, H)
    assert jnp.allclose(out_f32, ref, atol=1e-5, rtol=1e-5), "f32 path mismatch vs reference"

    # 2) default fast path: bf16 MXU operands, f32 accumulation / norm -> loose tolerance.
    params_bf16 = prepare_mtp_head_params(w1, b1, w2, b2, gamma, compute_dtype=jnp.bfloat16)
    out_bf16 = jax.block_until_ready(lightweight_mtp_head(prev_attention_output, params_bf16, eps=eps))
    assert out_bf16.shape == (B, S, H)
    assert jnp.allclose(out_bf16, ref, atol=2e-2, rtol=2e-2), "bf16 path mismatch vs reference"

    # 3) streamed-weight (H4-tiled) fallback path exercised explicitly (2 K-steps), f32 for tight check.
    H2 = 1024
    H42 = H2 // 4
    k2 = jax.random.split(jax.random.PRNGKey(1), 5)
    x2 = jax.random.normal(k2[0], (B, S, H2), dtype=jnp.float32)
    w1b = jax.random.uniform(k2[1], (H2, H42), jnp.float32, -1 / math.sqrt(H2), 1 / math.sqrt(H2))
    b1b = jnp.zeros((H42,), jnp.float32)
    w2b = jax.random.uniform(k2[2], (H42, H2), jnp.float32, -1 / math.sqrt(H42), 1 / math.sqrt(H42))
    b2b = jax.random.uniform(k2[3], (H2,), jnp.float32, -1 / math.sqrt(H42), 1 / math.sqrt(H42))
    g2 = 1.0 + 0.02 * jax.random.normal(k2[4], (H2,), dtype=jnp.float32)
    ref2 = _reference(x2, w1b, b1b, w2b, b2b, g2, eps=eps)
    params2 = prepare_mtp_head_params(w1b, b1b, w2b, b2b, g2, compute_dtype=jnp.float32)
    out2 = jax.block_until_ready(
        lightweight_mtp_head(x2, params2, eps=eps, tk=128, force_weight_tiling=True))
    assert out2.shape == (B, S, H2)
    assert jnp.allclose(out2, ref2, atol=1e-4, rtol=1e-4), "k-tiled path mismatch vs reference"

    print("KERNEL_OK")
</pallas_src>

<mosaic_0001>
module attributes {stable_mosaic.version = 11 : i64} {
  func.func @_mtp_head_kernel(%arg0: i32, %arg1: memref<16x128xf32, #tpu.memory_space<vmem>>, %arg2: memref<128x128xf32, #tpu.memory_space<vmem>>, %arg3: memref<1x128xf32, #tpu.memory_space<vmem>>, %arg4: memref<128x128xf32, #tpu.memory_space<vmem>>, %arg5: memref<1x128xf32, #tpu.memory_space<vmem>>, %arg6: memref<1x128xf32, #tpu.memory_space<vmem>>, %arg7: memref<16x128xf32, #tpu.memory_space<vmem>>) attributes {dimension_semantics = [#tpu.dimension_semantics<parallel>], iteration_bounds = array<i64: 1>, scalar_prefetch = 0 : i64, scratch_operands = 0 : i64, tpu.core_type = #tpu.core_type<tc>, window_params = [{transform_indices = @transform_0, window_bounds = array<i64: 16, 128>}, {pipeline_mode = #tpu.pipeline_mode<synchronous>, transform_indices = @transform_1, window_bounds = array<i64: 128, 128>}, {pipeline_mode = #tpu.pipeline_mode<synchronous>, transform_indices = @transform_2, window_bounds = array<i64: 1, 128>}, {pipeline_mode = #tpu.pipeline_mode<synchronous>, transform_indices = @transform_3, window_bounds = array<i64: 128, 128>}, {pipeline_mode = #tpu.pipeline_mode<synchronous>, transform_indices = @transform_4, window_bounds = array<i64: 1, 128>}, {pipeline_mode = #tpu.pipeline_mode<synchronous>, transform_indices = @transform_5, window_bounds = array<i64: 1, 128>}, {transform_indices = @transform_6, window_bounds = array<i64: 16, 128>}]} {
    %c0 = arith.constant 0 : index
    %c0_0 = arith.constant 0 : index
    %0 = vector.load %arg1[%c0, %c0_0] : memref<16x128xf32, #tpu.memory_space<vmem>>, vector<16x128xf32>
    %c0_1 = arith.constant 0 : index
    %c0_2 = arith.constant 0 : index
    %1 = vector.load %arg2[%c0_1, %c0_2] : memref<128x128xf32, #tpu.memory_space<vmem>>, vector<128x128xf32>
    %cst = arith.constant dense<0.000000e+00> : vector<16x128xf32>
    %2 = tpu.matmul %0, %1, %cst {dimension_numbers = #tpu.dot_dimension_numbers<[1], [0], [0], [1], [0, 0, 1, 1], [], []>} : vector<16x128xf32>, vector<128x128xf32>, vector<16x128xf32> -> vector<16x128xf32>
    %c0_3 = arith.constant 0 : index
    %c0_4 = arith.constant 0 : index
    %3 = vector.load %arg3[%c0_3, %c0_4] : memref<1x128xf32, #tpu.memory_space<vmem>>, vector<1x128xf32>
    %4 = vector.broadcast %3 : vector<1x128xf32> to vector<16x128xf32>
    %5 = arith.addf %2, %4 : vector<16x128xf32>
    %cst_5 = arith.constant 5.000000e-01 : f32
    %6 = vector.broadcast %cst_5 : f32 to vector<16x128xf32>
    %7 = arith.mulf %6, %5 : vector<16x128xf32>
    %cst_6 = arith.constant 0.707106769 : f32
    %8 = vector.broadcast %cst_6 : f32 to vector<16x128xf32>
    %9 = arith.mulf %5, %8 : vector<16x128xf32>
    %10 = math.erf %9 : vector<16x128xf32>
    %cst_7 = arith.constant 1.000000e+00 : f32
    %11 = vector.broadcast %cst_7 : f32 to vector<16x128xf32>
    %12 = arith.addf %11, %10 : vector<16x128xf32>
    %13 = arith.mulf %7, %12 : vector<16x128xf32>
    %c0_8 = arith.constant 0 : index
    %c0_9 = arith.constant 0 : index
    %14 = vector.load %arg4[%c0_8, %c0_9] : memref<128x128xf32, #tpu.memory_space<vmem>>, vector<128x128xf32>
    %cst_10 = arith.constant dense<0.000000e+00> : vector<16x128xf32>
    %15 = tpu.matmul %13, %14, %cst_10 {dimension_numbers = #tpu.dot_dimension_numbers<[1], [0], [0], [1], [0, 0, 1, 1], [], []>} : vector<16x128xf32>, vector<128x128xf32>, vector<16x128xf32> -> vector<16x128xf32>
    %c0_11 = arith.constant 0 : index
    %c0_12 = arith.constant 0 : index
    %16 = vector.load %arg5[%c0_11, %c0_12] : memref<1x128xf32, #tpu.memory_space<vmem>>, vector<1x128xf32>
    %17 = vector.broadcast %16 : vector<1x128xf32> to vector<16x128xf32>
    %18 = arith.addf %15, %17 : vector<16x128xf32>
    %19 = arith.addf %0, %18 : vector<16x128xf32>
    %20 = arith.mulf %19, %19 : vector<16x128xf32>
    %cst_13 = arith.constant dense<0.000000e+00> : vector<16xf32>
    %21 = vector.multi_reduction <add>, %20, %cst_13 [1] : vector<16x128xf32> to vector<16xf32>
    %22 = vector.shape_cast %21 : vector<16xf32> to vector<16x1xf32>
    %cst_14 = arith.constant 3.125000e-02 : f32
    %23 = vector.broadcast %cst_14 : f32 to vector<16x1xf32>
    %24 = arith.mulf %22, %23 : vector<16x1xf32>
    %c0_15 = arith.constant 0 : index
    %c0_16 = arith.constant 0 : index
    %25 = vector.load %arg6[%c0_15, %c0_16] : memref<1x128xf32, #tpu.memory_space<vmem>>, vector<1x128xf32>
    %cst_17 = arith.constant 9.99999997E-7 : f32
    %26 = vector.broadcast %cst_17 : f32 to vector<16x1xf32>
    %27 = arith.addf %24, %26 : vector<16x1xf32>
    %28 = math.rsqrt %27 : vector<16x1xf32>
    %29 = vector.broadcast %28 : vector<16x1xf32> to vector<16x128xf32>
    %30 = arith.mulf %19, %29 : vector<16x128xf32>
    %31 = vector.broadcast %25 : vector<1x128xf32> to vector<16x128xf32>
    %32 = arith.mulf %31, %30 : vector<16x128xf32>
    %c0_18 = arith.constant 0 : index
    %c0_19 = arith.constant 0 : index
    %33 = vector.load %arg7[%c0_18, %c0_19] : memref<16x128xf32, #tpu.memory_space<vmem>>, vector<16x128xf32>
    tpu.vector_store %arg7[%c0_18, %c0_19], %32 {strides = array<i32>} : memref<16x128xf32, #tpu.memory_space<vmem>>, vector<16x128xf32>,
    return
  }
  func.func @transform_0(%arg0: i32) -> (i32, i32) {
    %c0_i32 = arith.constant 0 : i32
    %c0_i32_0 = arith.constant 0 : i32
    return %arg0, %c0_i32 : i32, i32
  }
  func.func @transform_1(%arg0: i32) -> (i32, i32) {
    %c0_i32 = arith.constant 0 : i32
    %c0_i32_0 = arith.constant 0 : i32
    %c0_i32_1 = arith.constant 0 : i32
    return %c0_i32, %c0_i32_0 : i32, i32
  }
  func.func @transform_2(%arg0: i32) -> (i32, i32) {
    %c0_i32 = arith.constant 0 : i32
    %c0_i32_0 = arith.constant 0 : i32
    %c0_i32_1 = arith.constant 0 : i32
    return %c0_i32, %c0_i32_0 : i32, i32
  }
  func.func @transform_3(%arg0: i32) -> (i32, i32) {
    %c0_i32 = arith.constant 0 : i32
    %c0_i32_0 = arith.constant 0 : i32
    %c0_i32_1 = arith.constant 0 : i32
    return %c0_i32, %c0_i32_0 : i32, i32
  }
  func.func @transform_4(%arg0: i32) -> (i32, i32) {
    %c0_i32 = arith.constant 0 : i32
    %c0_i32_0 = arith.constant 0 : i32
    %c0_i32_1 = arith.constant 0 : i32
    return %c0_i32, %c0_i32_0 : i32, i32
  }
  func.func @transform_5(%arg0: i32) -> (i32, i32) {
    %c0_i32 = arith.constant 0 : i32
    %c0_i32_0 = arith.constant 0 : i32
    %c0_i32_1 = arith.constant 0 : i32
    return %c0_i32, %c0_i32_0 : i32, i32
  }
  func.func @transform_6(%arg0: i32) -> (i32, i32) {
    %c0_i32 = arith.constant 0 : i32
    %c0_i32_0 = arith.constant 0 : i32
    return %arg0, %c0_i32 : i32, i32
  }
}

</mosaic_0001>

<bundles_post_ra>
// kernel: tpu_custom_call.1
= control target key start
LH: loop header
LB: loop body
LE: loop exit
PB: predicated region body
PF: predicated region fallthrough
CT: control target
= control target key end

     0   :  { %11 = vsyncpa [#allocation3], 0  ;;  %s720_s0 = inlined_call_operand.hbm [shape: f32[16,128], index: 0, kind: input, shape index: {}]   ;;  %s721_s1 = inlined_call_operand.hbm [shape: f32[128,128], index: 1, kind: input, shape index: {}]   ;;  %s722_s2 = inlined_call_operand.vmem [shape: f32[1,128], index: 2, kind: input, shape index: {}]   ;;  %s723_s3 = inlined_call_operand.hbm [shape: f32[128,128], index: 3, kind: input, shape index: {}]   ;;  %s724_s4 = inlined_call_operand.vmem [shape: f32[1,128], index: 4, kind: input, shape index: {}]   ;;  %s725_s5 = inlined_call_operand.vmem [shape: f32[1,128], index: 5, kind: input, shape index: {}]   ;;  %s726_s6 = inlined_call_operand.hbm [shape: f32[16,128], index: 6, kind: output, shape index: {}]  }
   0x1   :  { %12 = vsyncpa [#allocation6], 0 }
   0x2   :  { %13 = vsyncpa [#allocation4], 0  ;;  %s599_s21 = smov [#allocation5]   ;;  %s600_s23 = smov [#allocation2]  }
   0x3   :  { %s31_s22 = sshll.u32 %s599_s21, 4  ;;  %s19_s24 = sshll.u32 %s600_s23, 4  ;;  %s32_s22 = int_to_ptr.vmem [resolvable:$true] %s31_s22  ;;  %s640_s24 = int_to_ptr.vmem [resolvable:$true] %s19_s24 }
   0x4   :  { %s505_s27 = scalar_lea.hbm %s721_s1, 2048 }
   0x5   :  { %p506_p0 = scmp.ne.s32.totalorder %s721_s1, %s505_s27  ;;  %p509_p1 = scmp.lt.u32.totalorder %s505_s27, %s721_s1 }
   0x7   :  { %p511_p2 = pnand %p509_p1, %p506_p0 }
   0x9   :  { %514 = shalt.err (!%p511_p2)
}
   0xa   :  { %s515_s8 = scalar_lea.vmem %s32_s22, 2048  ;;  %p520_p4 = scmp.lt.s32.totalorder %s32_s22, %s32_s22 }
   0xb   :  { %p516_p3 = scmp.ne.s32.totalorder %s32_s22, %s515_s8  ;;  %p521_p5 = scmp.lt.s32.totalorder %s515_s8, %s515_s8 }
   0xd   :  { %p522_p6 = por %p521_p5, %p520_p4 }
   0xf   :  { %p523_p7 = pnand %p522_p6, %p516_p3 }
  0x11   :  { %526 = shalt.err (!%p523_p7)
}
  0x12   :  { %s601_s9 = smov 128   ;;  %s602_s10 = smov 8  }
  0x13   :  { %37 = dma.hbm_to_vmem [thread:$0]  %s721_s1, 2048, %s32_s22, [#allocation6], %s601_s9, %s601_s9, %s602_s10  }
  0x14   :  { %s527_s15 = scalar_lea.hbm %s720_s0, 256 }
  0x15   :  { %p528_p8 = scmp.ne.s32.totalorder %s720_s0, %s527_s15  ;;  %p531_p9 = scmp.lt.u32.totalorder %s527_s15, %s720_s0 }
  0x17   :  { %p533_p10 = pnand %p531_p9, %p528_p8 }
  0x19   :  { %536 = shalt.err (!%p533_p10)
}
  0x1a   :  { %s537_s20 = scalar_lea.vmem %s640_s24, 256  ;;  %p542_p12 = scmp.lt.s32.totalorder %s640_s24, %s640_s24 }
  0x1b   :  { %p538_p11 = scmp.ne.s32.totalorder %s640_s24, %s537_s20  ;;  %p543_p13 = scmp.lt.s32.totalorder %s537_s20, %s537_s20 }
  0x1d   :  { %p544_p0 = por %p543_p13, %p542_p12 }
  0x1f   :  { %p545_p1 = pnand %p544_p0, %p538_p11 }
  0x21   :  { %548 = shalt.err (!%p545_p1)
}
  0x22   :  { %25 = dma.hbm_to_vmem [thread:$0]  %s720_s0, 256, %s640_s24, [#allocation3], %s601_s9, %s601_s9, %s602_s10  }
  0x23   :  { %s603_s22 = smov [#allocation7]   ;;  %s549_s27 = scalar_lea.hbm %s723_s3, 2048 }
  0x24   :  { %s45_s23 = sshll.u32 %s603_s22, 4  ;;  %p550_p2 = scmp.ne.s32.totalorder %s723_s3, %s549_s27  ;;  %s46_s23 = int_to_ptr.vmem [resolvable:$true] %s45_s23 }
  0x25   :  { %p553_p3 = scmp.lt.u32.totalorder %s549_s27, %s723_s3 }
  0x27   :  { %p555_p4 = pnand %p553_p3, %p550_p2 }
  0x29   :  { %558 = shalt.err (!%p555_p4)
}
  0x2a   :  { %s559_s8 = scalar_lea.vmem %s46_s23, 2048  ;;  %p564_p6 = scmp.lt.s32.totalorder %s46_s23, %s46_s23 }
  0x2b   :  { %p560_p5 = scmp.ne.s32.totalorder %s46_s23, %s559_s8  ;;  %p565_p7 = scmp.lt.s32.totalorder %s559_s8, %s559_s8 }
  0x2d   :  { %p566_p8 = por %p565_p7, %p564_p6 }
  0x2f   :  { %p567_p9 = pnand %p566_p8, %p560_p5 }
  0x31   :  { %570 = shalt.err (!%p567_p9)
}
  0x32   :  { %51 = dma.hbm_to_vmem [thread:$0]  %s723_s3, 2048, %s46_s23, [#allocation6], %s601_s9, %s601_s9, %s602_s10  }
  0x33   :  { %593 = dma.done.wait [#allocation3], 256  }
  0x34   :  { %594 = vsyncadd [#allocation3], 4294967040 }
  0x35   :  { %595 = dma.done.wait [#allocation6], 4096  }
  0x36   :  { %596 = vsyncadd [#allocation6], 4294963200  ;;  %v67_v0 = vld [vmem:[#allocation5] sm:$0xff]  ;;  %v68_v1 = vld [vmem:[#allocation5 + $0x8] sm:$0xff]  ;;  %s604_s14 = smov [#allocation8]  }
  0x37   :  { %v69_v2 = vld [vmem:[#allocation5 + $0x10] sm:$0xff]  ;;  %v427_v3 = vpack.c.bf16 %v68_v1, %v67_v0  ;;  %v70_v4 = vld [vmem:[#allocation5 + $0x18] sm:$0xff]  ;;  %v71_v6 = vld [vmem:[#allocation5 + $0x20] sm:$0xff]  ;;  %s305_s15 = sshll.u32 %s604_s14, 4  ;;  %s306_s15 = int_to_ptr.vmem [resolvable:$true] %s305_s15 }
  0x38   :  { %v431_v5 = vpack.c.bf16 %v70_v4, %v69_v2  ;;  %v72_v7 = vld [vmem:[#allocation5 + $0x28] sm:$0xff]  ;;  %v73_v9 = vld [vmem:[#allocation5 + $0x30] sm:$0xff]  ;;  %v74_v10 = vld [vmem:[#allocation5 + $0x38] sm:$0xff]  ;;  %s571_s16 = scalar_lea.vmem %s306_s15, 256  ;;  %p576_p11 = scmp.lt.s32.totalorder %s306_s15, %s306_s15 }
  0x39   :  { %428 = vmatprep.subr.bf16.mxu0 %v427_v3  ;;  %v435_v8 = vpack.c.bf16 %v72_v7, %v71_v6  ;;  %v692_v11 = vld [vmem:[#allocation2] sm:$0xff]  ;;  %v175_v12 = vld [vmem:[#allocation7] sm:$0xff]  ;;  %v176_v13 = vld [vmem:[#allocation7 + $0x8] sm:$0xff]  ;;  %v439_v20 = vpack.c.bf16 %v74_v10, %v73_v9  ;;  %p572_p10 = scmp.ne.s32.totalorder %s306_s15, %s571_s16  ;;  %p577_p12 = scmp.lt.s32.totalorder %s571_s16, %s571_s16 }
  0x3a   :  { %430 = vmatpush3.bf16.msra.mxu0 %v427_v3  ;;  %389 = vmatprep.mubr.f32.mxu0 %v692_v11  ;;  %v177_v14 = vld [vmem:[#allocation7 + $0x10] sm:$0xff]  ;;  %v459_v15 = vpack.c.bf16 %v176_v13, %v175_v12  ;;  %v178_v16 = vld [vmem:[#allocation7 + $0x18] sm:$0xff]  ;;  %v179_v18 = vld [vmem:[#allocation7 + $0x20] sm:$0xff] }
  0x3b   :  { %432 = vmatprep.subr.bf16.mxu0 %v431_v5  ;;  %v463_v17 = vpack.c.bf16 %v178_v16, %v177_v14  ;;  %v180_v19 = vld [vmem:[#allocation7 + $0x28] sm:$0xff]  ;;  %v75_v21 = vld [vmem:[#allocation5 + $0x40] sm:$0xff]  ;;  %v77_v25 = vld [vmem:[#allocation5 + $0x50] sm:$0xff]  ;;  %p578_p13 = por %p577_p12, %p576_p11 }
  0x3c   :  { %460 = vmatprep.subr.bf16.mxu1 %v459_v15  ;;  %v76_v22 = vld [vmem:[#allocation5 + $0x48] sm:$0xff]  ;;  %v467_v23 = vpack.c.bf16 %v180_v19, %v179_v18  ;;  %v78_v26 = vld [vmem:[#allocation5 + $0x58] sm:$0xff]  ;;  %v79_v28 = vld [vmem:[#allocation5 + $0x60] sm:$0xff] }
  0x3d   :  { %462 = vmatpush3.bf16.msra.mxu1 %v459_v15  ;;  %v443_v24 = vpack.c.bf16 %v76_v22, %v75_v21  ;;  %v447_v27 = vpack.c.bf16 %v78_v26, %v77_v25  ;;  %v80_v29 = vld [vmem:[#allocation5 + $0x68] sm:$0xff]  ;;  %v81_v31 = vld [vmem:[#allocation5 + $0x70] sm:$0xff]  ;;  %v82_v32 = vld [vmem:[#allocation5 + $0x78] sm:$0xff]  ;;  %p579_p0 = pnand %p578_p13, %p572_p10 }
  0x3e   :  { %434 = vmatpush3.bf16.msra.mxu0 %v431_v5  ;;  %464 = vmatprep.subr.bf16.mxu1 %v463_v17  ;;  %v451_v30 = vpack.c.bf16 %v80_v29, %v79_v28  ;;  %v455_v33 = vpack.c.bf16 %v82_v32, %v81_v31  ;;  %v66_v34 = vld [vmem:[#allocation2 + $0x8] sm:$0xff]  ;;  %v181_v35 = vld [vmem:[#allocation7 + $0x30] sm:$0xff]  ;;  %v183_v38 = vld [vmem:[#allocation7 + $0x40] sm:$0xff] }
  0x3f   :  { %436 = vmatprep.subr.bf16.mxu0 %v435_v8  ;;  %v182_v36 = vld [vmem:[#allocation7 + $0x38] sm:$0xff]  ;;  %v184_v39 = vld [vmem:[#allocation7 + $0x48] sm:$0xff]  ;;  %v185_v41 = vld [vmem:[#allocation7 + $0x50] sm:$0xff] }
  0x40   :  { %v471_v37 = vpack.c.bf16 %v182_v36, %v181_v35  ;;  %v475_v40 = vpack.c.bf16 %v184_v39, %v183_v38  ;;  %v186_v42 = vld [vmem:[#allocation7 + $0x58] sm:$0xff]  ;;  %v187_v44 = vld [vmem:[#allocation7 + $0x60] sm:$0xff]  ;;  %v188_v45 = vld [vmem:[#allocation7 + $0x68] sm:$0xff] }
  0x41   :  { %466 = vmatpush3.bf16.msra.mxu1 %v463_v17  ;;  %v479_v43 = vpack.c.bf16 %v186_v42, %v185_v41  ;;  %v483_v46 = vpack.c.bf16 %v188_v45, %v187_v44  ;;  %v189_v47 = vld [vmem:[#allocation7 + $0x70] sm:$0xff]  ;;  %v190_v48 = vld [vmem:[#allocation7 + $0x78] sm:$0xff] }
  0x42   :  { %438 = vmatpush3.bf16.msra.mxu0 %v435_v8  ;;  %468 = vmatprep.subr.bf16.mxu1 %v467_v23  ;;  %v487_v49 = vpack.c.bf16 %v190_v48, %v189_v47  ;;  %v318_v50 = vld [vmem:[%s722_s2] ss:$0 sm:$0xff] }
  0x43   :  { %440 = vmatprep.subr.bf16.mxu0 %v439_v20  ;;  %v319_v1 = vld [vmem:[%s724_s4] ss:$0 sm:$0xff] }
  0x44   :  { %v320_v18 = vld [vmem:[%s725_s5] ss:$0 sm:$0xff] }
  0x45   :  { %470 = vmatpush3.bf16.msra.mxu1 %v467_v23 }
  0x46   :  { %442 = vmatpush3.bf16.msra.mxu0 %v439_v20  ;;  %472 = vmatprep.subr.bf16.mxu1 %v471_v37 }
  0x47   :  { %444 = vmatprep.subr.bf16.mxu0 %v443_v24 }
  0x49   :  { %474 = vmatpush3.bf16.msra.mxu1 %v471_v37 }
  0x4a   :  { %446 = vmatpush3.bf16.msra.mxu0 %v443_v24  ;;  %476 = vmatprep.subr.bf16.mxu1 %v475_v40 }
  0x4b   :  { %448 = vmatprep.subr.bf16.mxu0 %v447_v27 }
  0x4d   :  { %478 = vmatpush3.bf16.msra.mxu1 %v475_v40 }
  0x4e   :  { %450 = vmatpush3.bf16.msra.mxu0 %v447_v27  ;;  %480 = vmatprep.subr.bf16.mxu1 %v479_v43 }
  0x4f   :  { %452 = vmatprep.subr.bf16.mxu0 %v451_v30 }
  0x51   :  { %482 = vmatpush3.bf16.msra.mxu1 %v479_v43 }
  0x52   :  { %454 = vmatpush3.bf16.msra.mxu0 %v451_v30  ;;  %484 = vmatprep.subr.bf16.mxu1 %v483_v46 }
  0x53   :  { %456 = vmatprep.subr.bf16.mxu0 %v455_v33 }
  0x55   :  { %486 = vmatpush3.bf16.msra.mxu1 %v483_v46 }
  0x56   :  { %458 = vmatpush3.bf16.msra.mxu0 %v455_v33  ;;  %488 = vmatprep.subr.bf16.mxu1 %v487_v49 }
  0x59   :  { %390 = vmatmul.mubr.f32.vlgmr.msra.gmra.mrb[0].mxu0 %v66_v34  ;;  %490 = vmatpush3.bf16.msra.mxu1 %v487_v49 }
 0x12c   :  { %v391_v51 = vpop.f32.mrb[0].mxu0 }
 0x12d   :  { %v162_v52 = vadd.f32 %v391_v51, %v318_v50  ;;  %v156_v53 = vpop.f32.mrb[1].mxu0 }
 0x12e   :  { %v157_v54 = vadd.f32 %v318_v50, %v156_v53 }
 0x12f   :  { %v168_v55 = vmul.f32 0.70710677, %v162_v52  ;;  %v166_v62 = vmul.f32 0.5, %v162_v52 }
 0x130   :  { %v167_v56 = vmul.f32 0.70710677, %v157_v54  ;;  %v165_v60 = vmul.f32 0.5, %v157_v54 }
 0x131   :  { %497 = verf.f32 %v168_v55 }
 0x132   :  { %499 = verf.f32 %v167_v56 }
 0x13b   :  { %v498_v57 = vpop.eup %497 }
 0x13c   :  { %v500_v58 = vpop.eup %499  ;;  %v172_v59 = vadd.f32 1.0, %v498_v57 }
 0x13d   :  { %v171_v61 = vadd.f32 1.0, %v500_v58 }
 0x13e   :  { %v174_v0 = vmul.f32 %v172_v59, %v166_v62 }
 0x13f   :  { %v173_v63 = vmul.f32 %v171_v61, %v165_v60 }
 0x141   :  { %424 = vmatprep.mubr.f32.mxu1 %v173_v63 }
 0x142   :  { %425 = vmatmul.mubr.f32.vlgmr.msra.gmra.mrb[0].mxu1 %v174_v0 }
 0x215   :  { %v426_v2 = vpop.f32.mrb[0].mxu1 }
 0x216   :  { %v264_v3 = vpop.f32.mrb[1].mxu1  ;;  %v270_v4 = vadd.f32 %v426_v2, %v319_v1 }
 0x217   :  { %v265_v5 = vadd.f32 %v319_v1, %v264_v3 }
 0x218   :  { %v274_v7 = vadd.f32 %v270_v4, %v66_v34 }
 0x219   :  { %v273_v6 = vadd.f32 %v265_v5, %v692_v11 }
 0x21a   :  { %v276_v9 = vmul.f32 %v274_v7, %v274_v7 }
 0x21b   :  { %v275_v8 = vmul.f32 %v273_v6, %v273_v6 }
 0x21d   :  { %277 = vadd.xlane.f32.xlu0 %v275_v8 }
 0x221   :  { %279 = vadd.xlane.f32.xlu0 %v276_v9 }
 0x2aa   :  { %v278_v10 = vpop.xlane.xlu0 %277 }
 0x2ab   :  { %v281_v12 = vmul.f32 0.03125, %v278_v10 }
 0x2ad   :  { %v284_v13 = vadd.f32 1e-06, %v281_v12 }
 0x2ae   :  { %v280_v14 = vpop.xlane.xlu0 %279 }
 0x2af   :  { %501 = vrsqrt.f32 %v284_v13  ;;  %v282_v15 = vmul.f32 0.03125, %v280_v14 }
 0x2b1   :  { %v285_v16 = vadd.f32 1e-06, %v282_v15 }
 0x2b3   :  { %503 = vrsqrt.f32 %v285_v16 }
 0x2b9   :  { %v502_v17 = vpop.eup %501 }
 0x2ba   :  { %v288_v19 = vmul.f32 %v502_v17, %v273_v6 }
 0x2bc   :  { %v296_v11 = vmul.f32 %v320_v18, %v288_v19 }
 0x2bd   :  { %v504_v20 = vpop.eup %503 }
 0x2be   :  { %v289_v21 = vmul.f32 %v504_v20, %v274_v7  ;;  %298 = vst [vmem:[#allocation8] sm:$0xff] %v296_v11 }
 0x2c0   :  { %v297_v22 = vmul.f32 %v320_v18, %v289_v21 }
 0x2c2   :  { %299 = vst [vmem:[#allocation8 + $0x8] sm:$0xff] %v297_v22 }
 0x2c3   :  { %582 = shalt.err (!%p579_p0)
}
 0x2c4   :  { %s583_s5 = scalar_lea.hbm %s726_s6, 256 }
 0x2c5   :  { %p584_p1 = scmp.ne.s32.totalorder %s726_s6, %s583_s5  ;;  %p587_p2 = scmp.lt.u32.totalorder %s583_s5, %s726_s6 }
 0x2c7   :  { %p589_p3 = pnand %p587_p2, %p584_p1 }
 0x2c9   :  { %592 = shalt.err (!%p589_p3)
}
 0x2ca   :  { %311 = dma.vmem_to_hbm [thread:$0]  %s306_s15, 256, %s726_s6, [#allocation4], %s601_s9, %s601_s9, %s602_s10  }
 0x2cb   :  { %597 = dma.done.wait [#allocation4], 256  }
 0x2cc   :  { %598 = vsyncadd [#allocation4], 4294967040 }
 0x2cd   :  { %315 = vsyncpa [#allocation3], 1 }
 0x2ce   :  { %316 = vsyncpa [#allocation6], 1 }
 0x2cf   :  { %317 = vsyncpa [#allocation4], 1 }

</bundles_post_ra>
